<compile_context>
chip_gen: v6e
topology: v6e:2x2x1
jax: 0.10.0
libtpu: 0.0.40
codegen_flags: <defaults>
</compile_context>

<pallas_src>
import jax
import jax.numpy as jnp
from jax.experimental import pallas as pl
from jax.experimental.pallas import tpu as pltpu


def critic_kernel(x_ref, w1_ref, b1_ref, w2_ref, b2_ref, o_ref):
    # x_ref  : (TB, F) bf16   -- one batch tile
    # w1_ref : (F, H)  bf16   -- VMEM resident across the grid
    # b1_ref : (1, H)  f32
    # w2_ref : (1, H)  f32    -- second-layer weights as a lane-dense row
    # b2_ref : (1, 1)  f32    -- scalar, SMEM
    # o_ref  : (TB, 1) f32
    # Layer 1 on the MXU: bf16 inputs, f32 accumulation.
    h = jnp.dot(x_ref[...], w1_ref[...], preferred_element_type=jnp.float32)
    h = jnp.maximum(h + b1_ref[...], 0.0)
    # Layer 2 (64 -> 1) on VPU (mul) + XLU (lane reduce) instead of a 1-wide matmul.
    v = jnp.sum(h * w2_ref[...], axis=-1, keepdims=True)
    o_ref[...] = v + b2_ref[0, 0]


def _round_up(n, m):
    return ((n + m - 1) // m) * m


def critic_forward(x, w1, b1, w2, b2, *, tile_b=1024):
    """relu(x @ w1 + b1) @ w2 + b2, squeezed (matches the PyTorch forward).

    x : (B, n_features) f32
    w1: (n_features, H) f32, b1: (1, H) f32
    w2: (H, 1) f32,          b2: (1, 1) f32
    """
    B, F = x.shape
    H = w1.shape[1]

    # Batch tiling: big batches use pipelined `tile_b`-row tiles; tiny batches
    # collapse to a single full-array block (block == array, so no (8,128) issue).
    if B <= tile_b:
        tb = _round_up(max(B, 1), 16)          # sublane multiple (bf16 packs 16 rows)
    else:
        tb = tile_b
    b_pad = _round_up(B, tb)
    num_tiles = b_pad // tb

    if b_pad != B:
        x = jnp.pad(x, ((0, b_pad - B), (0, 0)))

    x_bf = x.astype(jnp.bfloat16)
    w1_bf = w1.astype(jnp.bfloat16)
    b1_f = b1.reshape(1, H).astype(jnp.float32)
    w2_row = w2.reshape(1, H).astype(jnp.float32)   # (H,1) column -> (1,H) row
    b2_f = b2.reshape(1, 1).astype(jnp.float32)

    out = pl.pallas_call(
        critic_kernel,
        out_shape=jax.ShapeDtypeStruct((b_pad, 1), jnp.float32),
        grid=(num_tiles,),
        in_specs=[
            pl.BlockSpec((tb, F), lambda i: (i, 0)),            # x: tiled over batch
            pl.BlockSpec((F, H), lambda i: (0, 0)),             # w1: resident
            pl.BlockSpec((1, H), lambda i: (0, 0)),             # b1: resident
            pl.BlockSpec((1, H), lambda i: (0, 0)),             # w2 row: resident
            pl.BlockSpec(memory_space=pltpu.MemorySpace.SMEM),  # b2: scalar in SMEM
        ],
        out_specs=pl.BlockSpec((tb, 1), lambda i: (i, 0)),
        compiler_params=pltpu.CompilerParams(
            dimension_semantics=("parallel",),
        ),
    )(x_bf, w1_bf, b1_f, w2_row, b2_f)

    # Drop padding rows; mimic torch's .squeeze() (scalar for B == 1).
    return jnp.squeeze(out[:B, 0])


def init_params(key, n_features, hidden=64):
    # Deterministic synthetic init mimicking nn.Linear default (+/- 1/sqrt(fan_in)).
    k1, k2, k3, k4 = jax.random.split(key, 4)
    lim1 = 1.0 / (n_features ** 0.5)
    lim2 = 1.0 / (hidden ** 0.5)
    w1 = jax.random.uniform(k1, (n_features, hidden), jnp.float32, -lim1, lim1)
    b1 = jax.random.uniform(k2, (1, hidden), jnp.float32, -lim1, lim1)
    w2 = jax.random.uniform(k3, (hidden, 1), jnp.float32, -lim2, lim2)
    b2 = jax.random.uniform(k4, (1, 1), jnp.float32, -lim2, lim2)
    return w1, b1, w2, b2


def _reference(x, w1, b1, w2, b2):
    # Same math with the same bf16 rounding of the layer-1 operands.
    xb = x.astype(jnp.bfloat16).astype(jnp.float32)
    w1b = w1.astype(jnp.bfloat16).astype(jnp.float32)
    return jnp.squeeze(jnp.maximum(xb @ w1b + b1, 0.0) @ w2 + b2)


if __name__ == "__main__":
    key = jax.random.PRNGKey(0)
    kx, kp, kx2 = jax.random.split(key, 3)

    B = 8            # small demo batch of states
    N_FEATURES = 32  # n_features
    HIDDEN = 64      # HIDDEN_UNITS

    w1, b1, w2, b2 = init_params(kp, N_FEATURES, HIDDEN)

    # Small-batch path (single tile).
    x = jax.random.normal(kx, (B, N_FEATURES), dtype=jnp.float32)
    values = jax.block_until_ready(critic_forward(x, w1, b1, w2, b2))
    ref = _reference(x, w1, b1, w2, b2)
    assert values.shape == (B,)
    assert jnp.allclose(values, ref, atol=1e-3, rtol=1e-3)

    # Multi-tile path: exercises batch tiling, padding, and the parallel grid axis.
    B2 = 2000
    x2 = jax.random.normal(kx2, (B2, N_FEATURES), dtype=jnp.float32)
    values2 = jax.block_until_ready(critic_forward(x2, w1, b1, w2, b2))
    ref2 = _reference(x2, w1, b1, w2, b2)
    assert values2.shape == (B2,)
    assert jnp.allclose(values2, ref2, atol=1e-3, rtol=1e-3)

    # TODO(synk): training path (Adam step, MSE loss) and save/load are host-side
    # and intentionally not part of the Pallas forward kernel.
    print("KERNEL_OK")
</pallas_src>

<mosaic_0001>
module attributes {stable_mosaic.version = 11 : i64} {
  func.func @critic_kernel(%arg0: i32, %arg1: memref<16x32xbf16, #tpu.memory_space<vmem>>, %arg2: memref<32x64xbf16, #tpu.memory_space<vmem>>, %arg3: memref<1x64xf32, #tpu.memory_space<vmem>>, %arg4: memref<1x64xf32, #tpu.memory_space<vmem>>, %arg5: memref<1x1xf32, #tpu.memory_space<smem>>, %arg6: memref<16x1xf32, #tpu.memory_space<vmem>>) attributes {dimension_semantics = [#tpu.dimension_semantics<parallel>], iteration_bounds = array<i64: 1>, scalar_prefetch = 0 : i64, scratch_operands = 0 : i64, tpu.core_type = #tpu.core_type<tc>, window_params = [{transform_indices = @transform_0, window_bounds = array<i64: 16, 32>}, {pipeline_mode = #tpu.pipeline_mode<synchronous>, transform_indices = @transform_1, window_bounds = array<i64: 32, 64>}, {pipeline_mode = #tpu.pipeline_mode<synchronous>, transform_indices = @transform_2, window_bounds = array<i64: 1, 64>}, {pipeline_mode = #tpu.pipeline_mode<synchronous>, transform_indices = @transform_3, window_bounds = array<i64: 1, 64>}, {transform_indices = @transform_4, window_bounds = array<i64: 1, 1>}, {transform_indices = @transform_5, window_bounds = array<i64: 16, 1>}]} {
    %c0 = arith.constant 0 : index
    %c0_0 = arith.constant 0 : index
    %0 = vector.load %arg1[%c0, %c0_0] : memref<16x32xbf16, #tpu.memory_space<vmem>>, vector<16x32xbf16>
    %c0_1 = arith.constant 0 : index
    %c0_2 = arith.constant 0 : index
    %1 = vector.load %arg2[%c0_1, %c0_2] : memref<32x64xbf16, #tpu.memory_space<vmem>>, vector<32x64xbf16>
    %cst = arith.constant dense<0.000000e+00> : vector<16x64xf32>
    %2 = tpu.matmul %0, %1, %cst {dimension_numbers = #tpu.dot_dimension_numbers<[1], [0], [0], [1], [0, 0, 1, 1], [], []>} : vector<16x32xbf16>, vector<32x64xbf16>, vector<16x64xf32> -> vector<16x64xf32>
    %c0_3 = arith.constant 0 : index
    %c0_4 = arith.constant 0 : index
    %3 = vector.load %arg3[%c0_3, %c0_4] : memref<1x64xf32, #tpu.memory_space<vmem>>, vector<1x64xf32>
    %4 = vector.broadcast %3 : vector<1x64xf32> to vector<16x64xf32>
    %5 = arith.addf %2, %4 : vector<16x64xf32>
    %cst_5 = arith.constant 0.000000e+00 : f32
    %6 = vector.broadcast %cst_5 : f32 to vector<16x64xf32>
    %7 = arith.maximumf %5, %6 : vector<16x64xf32>
    %c0_6 = arith.constant 0 : index
    %c0_7 = arith.constant 0 : index
    %8 = vector.load %arg4[%c0_6, %c0_7] : memref<1x64xf32, #tpu.memory_space<vmem>>, vector<1x64xf32>
    %9 = vector.broadcast %8 : vector<1x64xf32> to vector<16x64xf32>
    %10 = arith.mulf %7, %9 : vector<16x64xf32>
    %cst_8 = arith.constant dense<0.000000e+00> : vector<16xf32>
    %11 = vector.multi_reduction <add>, %10, %cst_8 [1] : vector<16x64xf32> to vector<16xf32>
    %12 = vector.shape_cast %11 : vector<16xf32> to vector<16x1xf32>
    %c0_9 = arith.constant 0 : index
    %c0_10 = arith.constant 0 : index
    %13 = memref.load %arg5[%c0_9, %c0_10] : memref<1x1xf32, #tpu.memory_space<smem>>
    %14 = vector.broadcast %13 : f32 to vector<16x1xf32>
    %15 = arith.addf %12, %14 : vector<16x1xf32>
    %c0_11 = arith.constant 0 : index
    %c0_12 = arith.constant 0 : index
    %16 = vector.load %arg6[%c0_11, %c0_12] : memref<16x1xf32, #tpu.memory_space<vmem>>, vector<16x1xf32>
    tpu.vector_store %arg6[%c0_11, %c0_12], %15 {strides = array<i32>} : memref<16x1xf32, #tpu.memory_space<vmem>>, vector<16x1xf32>,
    return
  }
  func.func @transform_0(%arg0: i32) -> (i32, i32) {
    %c0_i32 = arith.constant 0 : i32
    %c0_i32_0 = arith.constant 0 : i32
    return %arg0, %c0_i32 : i32, i32
  }
  func.func @transform_1(%arg0: i32) -> (i32, i32) {
    %c0_i32 = arith.constant 0 : i32
    %c0_i32_0 = arith.constant 0 : i32
    %c0_i32_1 = arith.constant 0 : i32
    return %c0_i32, %c0_i32_0 : i32, i32
  }
  func.func @transform_2(%arg0: i32) -> (i32, i32) {
    %c0_i32 = arith.constant 0 : i32
    %c0_i32_0 = arith.constant 0 : i32
    %c0_i32_1 = arith.constant 0 : i32
    return %c0_i32, %c0_i32_0 : i32, i32
  }
  func.func @transform_3(%arg0: i32) -> (i32, i32) {
    %c0_i32 = arith.constant 0 : i32
    %c0_i32_0 = arith.constant 0 : i32
    %c0_i32_1 = arith.constant 0 : i32
    return %c0_i32, %c0_i32_0 : i32, i32
  }
  func.func @transform_4(%arg0: i32) -> (i32, i32) {
    %c0_i32 = arith.constant 0 : i32
    %c0_i32_0 = arith.constant 0 : i32
    %c0_i32_1 = arith.constant 0 : i32
    return %c0_i32, %c0_i32_0 : i32, i32
  }
  func.func @transform_5(%arg0: i32) -> (i32, i32) {
    %c0_i32 = arith.constant 0 : i32
    %c0_i32_0 = arith.constant 0 : i32
    return %arg0, %c0_i32 : i32, i32
  }
}

</mosaic_0001>

<bundles_post_ra>
// kernel: tpu_custom_call.1
= control target key start
LH: loop header
LB: loop body
LE: loop exit
PB: predicated region body
PF: predicated region fallthrough
CT: control target
= control target key end

     0   :  { %11 = vsyncpa [#allocation4], 0  ;;  %s283_s0 = inlined_call_operand.hbm [shape: bf16[16,32], index: 0, kind: input, shape index: {}]   ;;  %s284_s1 = inlined_call_operand.hbm [shape: bf16[32,64], index: 1, kind: input, shape index: {}]   ;;  %s285_s2 = inlined_call_operand.vmem [shape: f32[1,64], index: 2, kind: input, shape index: {}]   ;;  %s286_s3 = inlined_call_operand.vmem [shape: f32[1,64], index: 3, kind: input, shape index: {}]   ;;  %s287_s4 = inlined_call_operand.<no memory space> [shape: f32[1,1], index: 4, kind: input, shape index: {}]   ;;  %s288_s5 = inlined_call_operand.vmem [shape: f32[16,1], index: 5, kind: output, shape index: {}]  }
   0x1   :  { %12 = vsyncpa [#allocation6], 0  ;;  %s226_s18 = smov [#allocation3]  }
   0x2   :  { %s18_s19 = sshll.u32 %s226_s18, 4  ;;  %s19_s19 = int_to_ptr.vmem [resolvable:$true] %s18_s19 }
   0x3   :  { %s190_s20 = scalar_lea.vmem %s19_s19, 128  ;;  %p195_p1 = scmp.lt.s32.totalorder %s19_s19, %s19_s19 }
   0x4   :  { %p191_p0 = scmp.ne.s32.totalorder %s19_s19, %s190_s20  ;;  %p196_p2 = scmp.lt.s32.totalorder %s190_s20, %s190_s20 }
   0x6   :  { %p197_p3 = por %p196_p2, %p195_p1 }
   0x8   :  { %p198_p4 = pnand %p197_p3, %p191_p0 }
   0xa   :  { %201 = shalt.err (!%p198_p4)
}
   0xb   :  { %s227_s21 = smov 64   ;;  %s228_s22 = smov 4  }
   0xc   :  { %24 = dma.hbm_to_vmem [thread:$0]  %s283_s0, 128, %s19_s19, [#allocation4], %s227_s21, %s227_s21, %s228_s22  }
   0xd   :  { %s229_s25 = smov [#allocation5]  }
   0xe   :  { %s30_s26 = sshll.u32 %s229_s25, 4  ;;  %s31_s26 = int_to_ptr.vmem [resolvable:$true] %s30_s26 }
   0xf   :  { %s210_s27 = scalar_lea.vmem %s31_s26, 256  ;;  %p215_p6 = scmp.lt.s32.totalorder %s31_s26, %s31_s26 }
  0x10   :  { %p211_p5 = scmp.ne.s32.totalorder %s31_s26, %s210_s27  ;;  %p216_p7 = scmp.lt.s32.totalorder %s210_s27, %s210_s27 }
  0x12   :  { %p217_p8 = por %p216_p7, %p215_p6 }
  0x14   :  { %p218_p9 = pnand %p217_p8, %p211_p5 }
  0x16   :  { %221 = shalt.err (!%p218_p9)
}
  0x17   :  { %36 = dma.hbm_to_vmem [thread:$0]  %s284_s1, 256, %s31_s26, [#allocation6], %s227_s21, %s227_s21, %s228_s22  }
  0x18   :  { %222 = dma.done.wait [#allocation4], 128  }
  0x19   :  { %223 = vsyncadd [#allocation4], 4294967168 }
  0x1a   :  { %224 = dma.done.wait [#allocation6], 256  }
  0x1b   :  { %225 = vsyncadd [#allocation6], 4294967040  ;;  %v230_v0 = vmov 0.0   ;;  %vm231_vm0 = vmmov 0   ;;  %v179_v1 = vld [vmem:[#allocation5 + $0x8] sm:$0xff]   ;;  %v180_v2 = vld [vmem:[#allocation5] sm:$0xff]   ;;  %v144_v18 = vstv %s287_s4 }
  0x1c   :  { %165 = vmatprep.subr.bf16.mxu0 %v230_v0  ;;  %169 = vmatprep.mubr.msk.bf16.mxu0 %vm231_vm0, %v230_v0  ;;  %v181_v3 = vld [vmem:[#allocation3] sm:$0xff]   ;;  %vm80_vm1 = vcmask 261120   ;;  %vm136_vm2 = vcmask 523264   ;;  %vm147_vm3 = vcmask 7168  }
  0x1d   :  { %166 = vmatpush3.bf16.msra.mxu0 %v179_v1  ;;  %v156_v4 = vld [vmem:[%s285_s2] ss:$0 sm:$0xff] }
  0x1e   :  { %167 = vmatprep.subr.bf16.mxu0 %v230_v0  ;;  %v161_v8 = vld [vmem:[%s286_s3] ss:$0 sm:$0xff] }
  0x21   :  { %168 = vmatpush3.bf16.msra.mxu0 %v180_v2 }
  0x24   :  { %170 = vmatmul.mubr.msk.bf16.vlgmr.msra.gmra.mxu0 %vm80_vm1, %v181_v3 }
  0xe4   :  { %v118_v5 = vpop.f32.mrf.mxu0 }
  0xe5   :  { %v119_v6 = vadd.f32 %v156_v4, %v118_v5 }
  0xe6   :  { %v171_v7 = vpop.f32.mrf.mxu0 }
  0xe7   :  { %v125_v9 = vmax.f32 %v119_v6, 0.0 }
  0xe8   :  { %v121_v10 = vpop.f32.mrf.mxu0 }
  0xe9   :  { %v122_v11 = vadd.f32 %v156_v4, %v121_v10  ;;  %v134_v12 = vmul.f32 %v161_v8, %v125_v9 }
  0xea   :  { %v172_v13 = vpop.f32.mrf.mxu0 }
  0xeb   :  { %v126_v14 = vmax.f32 %v122_v11, 0.0  ;;  %v137_v15 = vsel %vm136_vm2, %v134_v12, 0.0 }
  0xec   :  { %138 = vadd.xlane.f32.xlu0 %v137_v15 }
  0xed   :  { %v135_v16 = vmul.f32 %v161_v8, %v126_v14 }
  0xef   :  { %v140_v17 = vsel %vm136_vm2, %v135_v16, 0.0 }
  0xf0   :  { %141 = vadd.xlane.f32.xlu0 %v140_v17 }
 0x175   :  { %v139_v19 = vpop.xlane.xlu0 %138 }
 0x176   :  { %v145_v20 = vadd.f32 %v144_v18, %v139_v19 }
 0x178   :  { %148 = vst.msk [vmem:[%s288_s5] sm:$0xff] %vm147_vm3, %v145_v20 }
 0x179   :  { %v142_v21 = vpop.xlane.xlu0 %141 }
 0x17a   :  { %v146_v22 = vadd.f32 %v144_v18, %v142_v21 }
 0x17c   :  { %149 = vst.msk [vmem:[%s288_s5 + $0x8] sm:$0xff] %vm147_vm3, %v146_v22 }
 0x17d   :  { %154 = vsyncpa [#allocation4], 1 }
 0x17e   :  { %155 = vsyncpa [#allocation6], 1 }

</bundles_post_ra>
